<compile_context>
chip_gen: v7x
topology: tpu7x:2x2x1
jax: 0.10.0
libtpu: 0.0.40
codegen_flags: <defaults>
</compile_context>

<pallas_src>
import functools

import jax
import jax.numpy as jnp
from jax.experimental import pallas as pl
from jax.experimental.pallas import tpu as pltpu


def _adjust_hue_kernel(x_ref, o_ref, *, factor):
    # x_ref block: (1, 3, TR, L)
    x = x_ref[...]
    dt = x.dtype
    r = x[0, 0]
    g = x[0, 1]
    b = x[0, 2]

    # ---- RGB -> HSV (matches torchvision _rgb2hsv) ----
    maxc = jnp.maximum(jnp.maximum(r, g), b)
    minc = jnp.minimum(jnp.minimum(r, g), b)
    eqc = maxc == minc
    cr = maxc - minc
    ones = jnp.ones_like(maxc)
    # Offload the divides to the EUP (exact reciprocal keeps the 1e-5 budget).
    inv_max = pl.reciprocal(jnp.where(eqc, ones, maxc), approx=False)
    inv_cr = pl.reciprocal(jnp.where(eqc, ones, cr), approx=False)
    s = cr * inv_max
    rc = (maxc - r) * inv_cr
    gc = (maxc - g) * inv_cr
    bc = (maxc - b) * inv_cr

    max_r = maxc == r
    max_g = maxc == g
    hr = max_r.astype(dt) * (bc - gc)
    hg = (max_g & (~max_r)).astype(dt) * (2.0 + rc - bc)
    hb = ((~max_g) & (~max_r)).astype(dt) * (4.0 + gc - rc)
    h = hr + hg + hb
    h = h * (1.0 / 6.0) + 1.0
    h = h - jnp.floor(h)  # == mod(h, 1.0); argument is finite
    v = maxc

    # ---- hue shift; factor in [-0.5, 0.5] => h + factor in [-0.5, 1.5) ----
    h = h + jnp.asarray(factor, dt)
    h = h - jnp.floor(h)  # == mod(h, 1.0)

    # ---- HSV -> RGB (matches torchvision _hsv2rgb) ----
    h6 = h * 6.0
    i_f = jnp.floor(h6)
    f = h6 - i_f
    # Float-domain "i % 6": i_f is in [0, 6]; map the h==1.0 edge (i_f==6) to 0
    # so the pixel does not fall through all six sector selects.
    i_sel = jnp.where(i_f >= 6.0, jnp.zeros_like(i_f), i_f)

    p = jnp.clip(v * (1.0 - s), 0.0, 1.0)
    q = jnp.clip(v * (1.0 - s * f), 0.0, 1.0)
    t = jnp.clip(v * (1.0 - s * (1.0 - f)), 0.0, 1.0)

    # Hoist the six sector masks once and reuse across the 3 channels.
    masks = [i_sel == float(k) for k in range(6)]

    def select(vals):
        out = jnp.zeros_like(v)
        for mk, val in zip(masks, vals):
            out = jnp.where(mk, val, out)
        return out

    # Direct per-channel stores — no stacked intermediate.
    o_ref[0, 0] = select([v, q, p, p, t, v]).astype(o_ref.dtype)
    o_ref[0, 1] = select([t, v, v, q, p, p]).astype(o_ref.dtype)
    o_ref[0, 2] = select([p, p, t, v, v, q]).astype(o_ref.dtype)


def _pick_row_tile(rows, lane):
    """Rows per block targeting ~<=2 MiB (3 * TR * lane * 4 bytes)."""
    max_tr = max(8, (2 << 20) // (3 * lane * 4))
    if rows <= max_tr:
        return rows  # full sublane extent of the array — always legal
    tr = (max_tr // 8) * 8  # multiple of 8 satisfies the (8,128) constraint
    for cand in range(tr, 7, -8):  # prefer a divisor of rows (no ragged edge)
        if rows % cand == 0:
            return cand
    return tr


def adjust_hue_pallas(x, factor):
    """x: (N, 3, H, W) float32 RGB in [0,1]; factor in [-0.5, 0.5]."""
    N, C, H, W = x.shape
    assert C == 3, "adjust_hue expects 3 RGB channels"
    hw = H * W

    # Lane-dense layout when possible: last dim a large multiple of 128.
    lane = None
    for cand in (1024, 512, 256, 128):
        if hw % cand == 0:
            lane = cand
            break
    if lane is not None:
        rows = hw // lane
        xr = x.reshape(N, C, rows, lane)
    else:
        # Fallback: keep (H, W) layout; last dim = full W (masked stores).
        rows, lane = H, W
        xr = x

    tr = _pick_row_tile(rows, lane)
    grid = (N, pl.cdiv(rows, tr))
    block = (1, 3, tr, lane)

    kernel = functools.partial(_adjust_hue_kernel, factor=float(factor))
    out = pl.pallas_call(
        kernel,
        out_shape=jax.ShapeDtypeStruct(xr.shape, x.dtype),
        grid_spec=pltpu.PrefetchScalarGridSpec(
            num_scalar_prefetch=0,
            grid=grid,
            in_specs=[pl.BlockSpec(block, lambda n, rbl: (n, 0, rbl, 0))],
            out_specs=pl.BlockSpec(block, lambda n, rbl: (n, 0, rbl, 0)),
        ),
        compiler_params=pltpu.CompilerParams(
            dimension_semantics=("parallel", "parallel")
        ),
    )(xr)
    return out.reshape(N, C, H, W)


# ---- pure-JAX reference (torchvision math) for a sanity check ----
def adjust_hue_ref(x, factor):
    r, g, b = x[:, 0], x[:, 1], x[:, 2]
    maxc = jnp.maximum(jnp.maximum(r, g), b)
    minc = jnp.minimum(jnp.minimum(r, g), b)
    eqc = maxc == minc
    cr = maxc - minc
    ones = jnp.ones_like(maxc)
    s = cr / jnp.where(eqc, ones, maxc)
    cr_div = jnp.where(eqc, ones, cr)
    rc = (maxc - r) / cr_div
    gc = (maxc - g) / cr_div
    bc = (maxc - b) / cr_div
    hr = (maxc == r) * (bc - gc)
    hg = ((maxc == g) & (maxc != r)) * (2.0 + rc - bc)
    hb = ((maxc != g) & (maxc != r)) * (4.0 + gc - rc)
    h = jnp.mod((hr + hg + hb) / 6.0 + 1.0, 1.0)
    v = maxc
    h = jnp.mod(h + factor, 1.0)
    i_f = jnp.floor(h * 6.0)
    f = h * 6.0 - i_f
    i = i_f.astype(jnp.int32) % 6
    p = jnp.clip(v * (1.0 - s), 0.0, 1.0)
    q = jnp.clip(v * (1.0 - s * f), 0.0, 1.0)
    t = jnp.clip(v * (1.0 - s * (1.0 - f)), 0.0, 1.0)

    def select(vals):
        out = jnp.zeros_like(v)
        for k, val in enumerate(vals):
            out = jnp.where(i == k, val, out)
        return out

    return jnp.stack(
        [select([v, q, p, p, t, v]),
         select([t, v, v, q, p, p]),
         select([p, p, t, v, v, q])],
        axis=1,
    )


if __name__ == "__main__":
    key = jax.random.PRNGKey(0)
    N, C, H, W = 2, 3, 16, 16
    x = jax.random.uniform(key, (N, C, H, W), dtype=jnp.float32)
    factor = 0.1  # HueTransform(factor=0.1); must be in [-0.5, 0.5]

    out = adjust_hue_pallas(x, factor)
    out = jax.block_until_ready(out)

    ref = adjust_hue_ref(x, factor)
    assert out.shape == (N, C, H, W)
    assert jnp.allclose(out, ref, atol=1e-5), "mismatch vs reference"
    print("KERNEL_OK")
</pallas_src>

<mosaic_0001>
module attributes {stable_mosaic.version = 11 : i64} {
  func.func @_adjust_hue_kernel(%arg0: i32, %arg1: i32, %arg2: memref<1x3x1x256xf32, #tpu.memory_space<vmem>>, %arg3: memref<1x3x1x256xf32, #tpu.memory_space<vmem>>) attributes {dimension_semantics = [#tpu.dimension_semantics<parallel>, #tpu.dimension_semantics<parallel>], iteration_bounds = array<i64: 2, 1>, scalar_prefetch = 0 : i64, scratch_operands = 0 : i64, tpu.core_type = #tpu.core_type<tc>, window_params = [{transform_indices = @transform_0, window_bounds = array<i64: 1, 3, 1, 256>}, {transform_indices = @transform_1, window_bounds = array<i64: 1, 3, 1, 256>}]} {
    %c0 = arith.constant 0 : index
    %c0_0 = arith.constant 0 : index
    %c0_1 = arith.constant 0 : index
    %c0_2 = arith.constant 0 : index
    %0 = vector.load %arg2[%c0, %c0_0, %c0_1, %c0_2] : memref<1x3x1x256xf32, #tpu.memory_space<vmem>>, vector<1x3x1x256xf32>
    %1 = vector.extract_strided_slice %0 {offsets = [0, 0, 0, 0], sizes = [1, 1, 1, 256], strides = [1, 1, 1, 1]} : vector<1x3x1x256xf32> to vector<1x1x1x256xf32>
    %2 = vector.shape_cast %1 : vector<1x1x1x256xf32> to vector<1x256xf32>
    %3 = vector.extract_strided_slice %0 {offsets = [0, 1, 0, 0], sizes = [1, 1, 1, 256], strides = [1, 1, 1, 1]} : vector<1x3x1x256xf32> to vector<1x1x1x256xf32>
    %4 = vector.shape_cast %3 : vector<1x1x1x256xf32> to vector<1x256xf32>
    %5 = vector.extract_strided_slice %0 {offsets = [0, 2, 0, 0], sizes = [1, 1, 1, 256], strides = [1, 1, 1, 1]} : vector<1x3x1x256xf32> to vector<1x1x1x256xf32>
    %6 = vector.shape_cast %5 : vector<1x1x1x256xf32> to vector<1x256xf32>
    %7 = arith.maximumf %2, %4 : vector<1x256xf32>
    %8 = arith.maximumf %7, %6 : vector<1x256xf32>
    %9 = arith.minimumf %2, %4 : vector<1x256xf32>
    %10 = arith.minimumf %9, %6 : vector<1x256xf32>
    %11 = arith.cmpf oeq, %8, %10 : vector<1x256xf32>
    %12 = arith.subf %8, %10 : vector<1x256xf32>
    %cst = arith.constant 1.000000e+00 : f32
    %13 = vector.broadcast %cst : f32 to vector<1x256xf32>
    %14 = arith.select %11, %13, %8 : vector<1x256xi1>, vector<1x256xf32>
    %15 = tpu.reciprocal %14 : vector<1x256xf32> -> vector<1x256xf32>
    %16 = arith.select %11, %13, %12 : vector<1x256xi1>, vector<1x256xf32>
    %17 = tpu.reciprocal %16 : vector<1x256xf32> -> vector<1x256xf32>
    %18 = arith.mulf %12, %15 : vector<1x256xf32>
    %19 = arith.subf %8, %2 : vector<1x256xf32>
    %20 = arith.mulf %19, %17 : vector<1x256xf32>
    %21 = arith.subf %8, %4 : vector<1x256xf32>
    %22 = arith.mulf %21, %17 : vector<1x256xf32>
    %23 = arith.subf %8, %6 : vector<1x256xf32>
    %24 = arith.mulf %23, %17 : vector<1x256xf32>
    %25 = arith.cmpf oeq, %8, %2 : vector<1x256xf32>
    %26 = arith.cmpf oeq, %8, %4 : vector<1x256xf32>
    %27 = arith.extui %25 : vector<1x256xi1> to vector<1x256xi32>
    %28 = arith.sitofp %27 : vector<1x256xi32> to vector<1x256xf32>
    %29 = arith.subf %24, %22 : vector<1x256xf32>
    %30 = arith.mulf %28, %29 : vector<1x256xf32>
    %cst_3 = arith.constant dense<true> : vector<1x256xi1>
    %31 = arith.xori %25, %cst_3 : vector<1x256xi1>
    %32 = arith.andi %26, %31 : vector<1x256xi1>
    %33 = arith.extui %32 : vector<1x256xi1> to vector<1x256xi32>
    %34 = arith.sitofp %33 : vector<1x256xi32> to vector<1x256xf32>
    %cst_4 = arith.constant 2.000000e+00 : f32
    %35 = vector.broadcast %cst_4 : f32 to vector<1x256xf32>
    %36 = arith.addf %35, %20 : vector<1x256xf32>
    %37 = arith.subf %36, %24 : vector<1x256xf32>
    %38 = arith.mulf %34, %37 : vector<1x256xf32>
    %cst_5 = arith.constant dense<true> : vector<1x256xi1>
    %39 = arith.xori %26, %cst_5 : vector<1x256xi1>
    %cst_6 = arith.constant dense<true> : vector<1x256xi1>
    %40 = arith.xori %25, %cst_6 : vector<1x256xi1>
    %41 = arith.andi %39, %40 : vector<1x256xi1>
    %42 = arith.extui %41 : vector<1x256xi1> to vector<1x256xi32>
    %43 = arith.sitofp %42 : vector<1x256xi32> to vector<1x256xf32>
    %cst_7 = arith.constant 4.000000e+00 : f32
    %44 = vector.broadcast %cst_7 : f32 to vector<1x256xf32>
    %45 = arith.addf %44, %22 : vector<1x256xf32>
    %46 = arith.subf %45, %20 : vector<1x256xf32>
    %47 = arith.mulf %43, %46 : vector<1x256xf32>
    %48 = arith.addf %30, %38 : vector<1x256xf32>
    %49 = arith.addf %48, %47 : vector<1x256xf32>
    %cst_8 = arith.constant 0.166666672 : f32
    %50 = vector.broadcast %cst_8 : f32 to vector<1x256xf32>
    %51 = arith.mulf %49, %50 : vector<1x256xf32>
    %cst_9 = arith.constant 1.000000e+00 : f32
    %52 = vector.broadcast %cst_9 : f32 to vector<1x256xf32>
    %53 = arith.addf %51, %52 : vector<1x256xf32>
    %54 = math.floor %53 : vector<1x256xf32>
    %55 = arith.subf %53, %54 : vector<1x256xf32>
    %cst_10 = arith.constant 1.000000e-01 : f32
    %56 = vector.broadcast %cst_10 : f32 to vector<1x256xf32>
    %57 = arith.addf %55, %56 : vector<1x256xf32>
    %58 = math.floor %57 : vector<1x256xf32>
    %59 = arith.subf %57, %58 : vector<1x256xf32>
    %cst_11 = arith.constant 6.000000e+00 : f32
    %60 = vector.broadcast %cst_11 : f32 to vector<1x256xf32>
    %61 = arith.mulf %59, %60 : vector<1x256xf32>
    %62 = math.floor %61 : vector<1x256xf32>
    %63 = arith.subf %61, %62 : vector<1x256xf32>
    %cst_12 = arith.constant 6.000000e+00 : f32
    %64 = vector.broadcast %cst_12 : f32 to vector<1x256xf32>
    %65 = arith.cmpf oge, %62, %64 : vector<1x256xf32>
    %cst_13 = arith.constant 0.000000e+00 : f32
    %66 = vector.broadcast %cst_13 : f32 to vector<1x256xf32>
    %67 = arith.select %65, %66, %62 : vector<1x256xi1>, vector<1x256xf32>
    %cst_14 = arith.constant 1.000000e+00 : f32
    %68 = vector.broadcast %cst_14 : f32 to vector<1x256xf32>
    %69 = arith.subf %68, %18 : vector<1x256xf32>
    %70 = arith.mulf %8, %69 : vector<1x256xf32>
    %cst_15 = arith.constant 0.000000e+00 : f32
    %cst_16 = arith.constant 1.000000e+00 : f32
    %71 = vector.broadcast %cst_15 : f32 to vector<1x256xf32>
    %72 = arith.maximumf %71, %70 : vector<1x256xf32>
    %73 = vector.broadcast %cst_16 : f32 to vector<1x256xf32>
    %74 = arith.minimumf %73, %72 : vector<1x256xf32>
    %75 = arith.mulf %18, %63 : vector<1x256xf32>
    %cst_17 = arith.constant 1.000000e+00 : f32
    %76 = vector.broadcast %cst_17 : f32 to vector<1x256xf32>
    %77 = arith.subf %76, %75 : vector<1x256xf32>
    %78 = arith.mulf %8, %77 : vector<1x256xf32>
    %cst_18 = arith.constant 0.000000e+00 : f32
    %cst_19 = arith.constant 1.000000e+00 : f32
    %79 = vector.broadcast %cst_18 : f32 to vector<1x256xf32>
    %80 = arith.maximumf %79, %78 : vector<1x256xf32>
    %81 = vector.broadcast %cst_19 : f32 to vector<1x256xf32>
    %82 = arith.minimumf %81, %80 : vector<1x256xf32>
    %cst_20 = arith.constant 1.000000e+00 : f32
    %83 = vector.broadcast %cst_20 : f32 to vector<1x256xf32>
    %84 = arith.subf %83, %63 : vector<1x256xf32>
    %85 = arith.mulf %18, %84 : vector<1x256xf32>
    %cst_21 = arith.constant 1.000000e+00 : f32
    %86 = vector.broadcast %cst_21 : f32 to vector<1x256xf32>
    %87 = arith.subf %86, %85 : vector<1x256xf32>
    %88 = arith.mulf %8, %87 : vector<1x256xf32>
    %cst_22 = arith.constant 0.000000e+00 : f32
    %cst_23 = arith.constant 1.000000e+00 : f32
    %89 = vector.broadcast %cst_22 : f32 to vector<1x256xf32>
    %90 = arith.maximumf %89, %88 : vector<1x256xf32>
    %91 = vector.broadcast %cst_23 : f32 to vector<1x256xf32>
    %92 = arith.minimumf %91, %90 : vector<1x256xf32>
    %cst_24 = arith.constant 0.000000e+00 : f32
    %93 = vector.broadcast %cst_24 : f32 to vector<1x256xf32>
    %94 = arith.cmpf oeq, %67, %93 : vector<1x256xf32>
    %cst_25 = arith.constant 1.000000e+00 : f32
    %95 = vector.broadcast %cst_25 : f32 to vector<1x256xf32>
    %96 = arith.cmpf oeq, %67, %95 : vector<1x256xf32>
    %cst_26 = arith.constant 2.000000e+00 : f32
    %97 = vector.broadcast %cst_26 : f32 to vector<1x256xf32>
    %98 = arith.cmpf oeq, %67, %97 : vector<1x256xf32>
    %cst_27 = arith.constant 3.000000e+00 : f32
    %99 = vector.broadcast %cst_27 : f32 to vector<1x256xf32>
    %100 = arith.cmpf oeq, %67, %99 : vector<1x256xf32>
    %cst_28 = arith.constant 4.000000e+00 : f32
    %101 = vector.broadcast %cst_28 : f32 to vector<1x256xf32>
    %102 = arith.cmpf oeq, %67, %101 : vector<1x256xf32>
    %cst_29 = arith.constant 5.000000e+00 : f32
    %103 = vector.broadcast %cst_29 : f32 to vector<1x256xf32>
    %104 = arith.cmpf oeq, %67, %103 : vector<1x256xf32>
    %cst_30 = arith.constant 0.000000e+00 : f32
    %105 = vector.broadcast %cst_30 : f32 to vector<1x256xf32>
    %106 = arith.select %94, %8, %105 : vector<1x256xi1>, vector<1x256xf32>
    %107 = arith.select %96, %82, %106 : vector<1x256xi1>, vector<1x256xf32>
    %108 = arith.select %98, %74, %107 : vector<1x256xi1>, vector<1x256xf32>
    %109 = arith.select %100, %74, %108 : vector<1x256xi1>, vector<1x256xf32>
    %110 = arith.select %102, %92, %109 : vector<1x256xi1>, vector<1x256xf32>
    %111 = arith.select %104, %8, %110 : vector<1x256xi1>, vector<1x256xf32>
    %c0_31 = arith.constant 0 : index
    %c0_32 = arith.constant 0 : index
    %c0_33 = arith.constant 0 : index
    %c0_34 = arith.constant 0 : index
    %112 = vector.load %arg3[%c0_31, %c0_32, %c0_33, %c0_34] : memref<1x3x1x256xf32, #tpu.memory_space<vmem>>, vector<1x1x1x256xf32>
    %113 = vector.shape_cast %112 : vector<1x1x1x256xf32> to vector<1x256xf32>
    %114 = vector.shape_cast %111 : vector<1x256xf32> to vector<1x1x1x256xf32>
    tpu.vector_store %arg3[%c0_31, %c0_32, %c0_33, %c0_34], %114 {strides = array<i32>} : memref<1x3x1x256xf32, #tpu.memory_space<vmem>>, vector<1x1x1x256xf32>,
    %cst_35 = arith.constant 0.000000e+00 : f32
    %115 = vector.broadcast %cst_35 : f32 to vector<1x256xf32>
    %116 = arith.select %94, %92, %115 : vector<1x256xi1>, vector<1x256xf32>
    %117 = arith.select %96, %8, %116 : vector<1x256xi1>, vector<1x256xf32>
    %118 = arith.select %98, %8, %117 : vector<1x256xi1>, vector<1x256xf32>
    %119 = arith.select %100, %82, %118 : vector<1x256xi1>, vector<1x256xf32>
    %120 = arith.select %102, %74, %119 : vector<1x256xi1>, vector<1x256xf32>
    %121 = arith.select %104, %74, %120 : vector<1x256xi1>, vector<1x256xf32>
    %c0_36 = arith.constant 0 : index
    %c1 = arith.constant 1 : index
    %c0_37 = arith.constant 0 : index
    %c0_38 = arith.constant 0 : index
    %122 = vector.load %arg3[%c0_36, %c1, %c0_37, %c0_38] : memref<1x3x1x256xf32, #tpu.memory_space<vmem>>, vector<1x1x1x256xf32>
    %123 = vector.shape_cast %122 : vector<1x1x1x256xf32> to vector<1x256xf32>
    %124 = vector.shape_cast %121 : vector<1x256xf32> to vector<1x1x1x256xf32>
    tpu.vector_store %arg3[%c0_36, %c1, %c0_37, %c0_38], %124 {strides = array<i32>} : memref<1x3x1x256xf32, #tpu.memory_space<vmem>>, vector<1x1x1x256xf32>,
    %cst_39 = arith.constant 0.000000e+00 : f32
    %125 = vector.broadcast %cst_39 : f32 to vector<1x256xf32>
    %126 = arith.select %94, %74, %125 : vector<1x256xi1>, vector<1x256xf32>
    %127 = arith.select %96, %74, %126 : vector<1x256xi1>, vector<1x256xf32>
    %128 = arith.select %98, %92, %127 : vector<1x256xi1>, vector<1x256xf32>
    %129 = arith.select %100, %8, %128 : vector<1x256xi1>, vector<1x256xf32>
    %130 = arith.select %102, %8, %129 : vector<1x256xi1>, vector<1x256xf32>
    %131 = arith.select %104, %82, %130 : vector<1x256xi1>, vector<1x256xf32>
    %c0_40 = arith.constant 0 : index
    %c2 = arith.constant 2 : index
    %c0_41 = arith.constant 0 : index
    %c0_42 = arith.constant 0 : index
    %132 = vector.load %arg3[%c0_40, %c2, %c0_41, %c0_42] : memref<1x3x1x256xf32, #tpu.memory_space<vmem>>, vector<1x1x1x256xf32>
    %133 = vector.shape_cast %132 : vector<1x1x1x256xf32> to vector<1x256xf32>
    %134 = vector.shape_cast %131 : vector<1x256xf32> to vector<1x1x1x256xf32>
    tpu.vector_store %arg3[%c0_40, %c2, %c0_41, %c0_42], %134 {strides = array<i32>} : memref<1x3x1x256xf32, #tpu.memory_space<vmem>>, vector<1x1x1x256xf32>,
    return
  }
  func.func @transform_0(%arg0: i32, %arg1: i32) -> (i32, i32, i32, i32) {
    %c0_i32 = arith.constant 0 : i32
    %c0_i32_0 = arith.constant 0 : i32
    %c0_i32_1 = arith.constant 0 : i32
    return %arg0, %c0_i32, %arg1, %c0_i32_0 : i32, i32, i32, i32
  }
  func.func @transform_1(%arg0: i32, %arg1: i32) -> (i32, i32, i32, i32) {
    %c0_i32 = arith.constant 0 : i32
    %c0_i32_0 = arith.constant 0 : i32
    %c0_i32_1 = arith.constant 0 : i32
    return %arg0, %c0_i32, %arg1, %c0_i32_0 : i32, i32, i32, i32
  }
}

</mosaic_0001>

<bundles_post_ra>
// kernel: tpu_custom_call.1
= control target key start
LH: loop header
LB: loop body
LE: loop exit
PB: predicated region body
PF: predicated region fallthrough
CT: control target
= control target key end

     0   :  { %6 = vsyncpa [#allocation3], 0  ;;  %s810_s0 = inlined_call_operand.hbm [shape: f32[2,3,1,256], index: 0, kind: input, shape index: {}]   ;;  %s811_s1 = inlined_call_operand.hbm [shape: f32[2,3,1,256], index: 1, kind: output, shape index: {}]  }
   0x1   :  { %8 = vsyncpa [#allocation3 + $0x1], 0 }
   0x2   :  { %9 = vsyncpa [#allocation4], 0 }
   0x3   :  { %11 = vsyncpa [#allocation4 + $0x1], 0  ;;  %s580_s6 = smov 0   ;;  %s582_s7 = smov 0  }
   0x4   :  { %s584_s8 = smov 0   ;;  %s586_s9 = smov 0  }
   0x5   :  { %s588_s10 = smov 0   ;;  %s590_s11 = smov 0  }
   0x6 LB: > { %s358_s12 = sadd.s32 4294967295, %s560_s11   ;;  %s359_s13 = sadd.s32 4294967294, %s560_s11   ;;  %s560_s11 = sphi %s590_s11, %s17_s11   ;;  %s556_s10 = sphi %s588_s10, %s828_s10   ;;  %s552_s9 = sphi %s586_s9, %s827_s9   ;;  %s548_s8 = sphi %s584_s8, %s826_s8   ;;  %s544_s7 = sphi %s582_s7, %s825_s7   ;;  %s540_s6 = sphi %s580_s6, %s824_s6  }
   0x7   : > { %s29_s14 = sadd.s32 1, %s556_s10  ;;  %s38_s15 = sadd.s32 1, %s548_s8 }
   0x8   : > { %p31_p0 = scmp.ge.s32.totalorder %s29_s14, 2  ;;  %p45_p1 = scmp.ne.s32.totalorder %s548_s8, %s544_s7 }
   0x9   : > { %p46_p2 = scmp.eq.s32.totalorder %s560_s11, 0  ;;  %p51_p3 = scmp.ne.s32.totalorder %s544_s7, %s540_s6 }
   0xa   : > { %s830_s14 = smov (%p31_p0, %s29_s14), 0  ;;  %p52_p5 = scmp.eq.s32.totalorder %s358_s12, 0 }
   0xb   : > { %p621_p4 = por %p46_p2, %p45_p1  ;;  %s33_s17 = ssub.s32 %s556_s10, %s830_s14 }
   0xc   : > { %p77_p6 = scmp.eq.s32.totalorder %s358_s12, 1  ;;  %p36_p7 = scmp.eq.s32.totalorder %s33_s17, 0 }
   0xd   : > { %p627_p8 = por %p52_p5, %p51_p3  ;;  %p83_p10 = scmp.eq.s32.totalorder %s359_s13, 1 }
   0xe   : > { %p631_p9 = por %p77_p6, %p45_p1  ;;  %p388_p13 = scmp.lt.s32.totalorder %s560_s11, 2 }
   0xf   : > { %s636_s20 = scalar_select %p36_p7, %s548_s8, %s38_s15  }
  0x10   : > { %s815_s19 = scalar_select %p631_p9, 1, 0 }
  0x11   : > { %p638_p11 = por %p83_p10, %p51_p3  ;;  %s103_s22 = sand.u32 1, %s548_s8  }
  0x12   : > { %s372_s23 = smul.u32 6, %s103_s22  ;;  %p648_p0 = pnand %p388_p13, %p621_p4 }
  0x13   : > { %s816_s21 = scalar_select %p638_p11, 1, 0 }
  0x14   : > { %s373_s24 = smul.u32 96, %s556_s10  ;;  %s107_s29 = scalar_lea.vmem [#allocation2], %s372_s23 }
  0x15   : > { %s116_s30 = sshll.u32 %s107_s29, 4  ;;  %s660_s2 = scalar_lea.sflag [#allocation3], %s103_s22  ;;  %s657_s30 = int_to_ptr.vmem [resolvable:$true] %s116_s30 }
  0x16   : > { %s655_s28 = scalar_lea.hbm %s810_s0, %s373_s24  ;;  %p450_p3 = pneg %p648_p0 }
  0x17   : > { %s448_s3 = scalar_lea.hbm %s655_s28, 96  ;;  %s453_s12 = scalar_lea.hbm %s810_s0, 192 }
  0x18   : > { %p449_p2 = scmp.ne.s32.totalorder %s655_s28, %s448_s3  ;;  %p454_p6 = scmp.lt.u32.totalorder %s655_s28, %s810_s0 }
  0x19   : > { %p455_p7 = scmp.lt.u32.totalorder %s453_s12, %s448_s3  ;;  %p457_p13 = scmp.lt.u32.totalorder %s448_s3, %s655_s28 }
  0x1a   : > { %p451_p4 = pnand %p450_p3, %p449_p2 }
  0x1b   : > { %p456_p10 = por %p455_p7, %p454_p6 }
  0x1c   : > { %p452_p5 = pneg %p451_p4 }
  0x1d   : > { %p458_p12 = por %p457_p13, %p456_p10 }
  0x1f   : > { %p459_p1 = pnand %p458_p12, %p452_p5 }
  0x21   : > { %462 = shalt.err (!%p459_p1)
}
  0x22   : > { %s463_s16 = scalar_lea.vmem %s657_s30, 96  ;;  %s562_s17 = smov [#allocation2]  }
  0x23   : > { %p464_p2 = scmp.ne.s32.totalorder %s657_s30, %s463_s16  ;;  %s468_s22 = sshll.u32 %s562_s17, 4  ;;  %s469_s22 = int_to_ptr.vmem [resolvable:$false] %s468_s22 }
  0x24   : > { %s470_s23 = scalar_lea.vmem %s469_s22, 192  ;;  %p471_p9 = scmp.lt.s32.totalorder %s657_s30, %s469_s22 }
  0x25   : > { %p466_p4 = pnand %p464_p2, %p450_p3  ;;  %p472_p6 = scmp.lt.s32.totalorder %s470_s23, %s463_s16 }
  0x27   : > { %p467_p11 = pneg %p466_p4  ;;  %p473_p7 = por %p472_p6, %p471_p9 }
  0x29   : > { %p474_p10 = pnand %p473_p7, %p467_p11 }
  0x2b   : > { %477 = shalt.err (!%p474_p10)
}
  0x2c   : > { %s563_s24 = smov 32   ;;  %s564_s26 = smov 2  }
  0x2d   : > { %383 = dma.hbm_to_vmem [thread:$0]  (!%p648_p0), %s655_s28, 96, %s657_s30, %s660_s2, %s563_s24, %s563_s24, %s564_s26  }
  0x2e   : > { %p124_p12 = scmp.lt.s32.totalorder %s560_s11, 3  ;;  %p818_p1 = scmp.ge.s32.totalorder %s560_s11, 1 }
  0x30   : > { %p125_p3 = pnand %p818_p1, %p124_p12 }
  0x31   : > { %s692_s27 = sand.u32 (!%p125_p3), 1, %s544_s7  }
  0x32   : > { %128 = sbr.rel (%p125_p3) target bundleno = 142 (0x8e), region = 24  ;;  %s131_s3 = scalar_lea.sflag (!%p125_p3), [#allocation3], %s692_s27 }
  0x33   : > { %s374_s29 = smul.u32 (!%p125_p3), 6, %s692_s27 }
  0x35   : > { %s134_s4 = scalar_lea.vmem (!%p125_p3), [#allocation2], %s374_s29 }
  0x39   : > { %531 = dma.done.wait (%p627_p8), %s131_s3, 96  }
  0x3a   : > { %533 = vsyncadd (%p627_p8), %s131_s3, 4294967200  ;;  %v153_v0 = vld [vmem:[%s134_s4] sm:$0x3]  ;;  %v154_v1 = vld [vmem:[%s134_s4 + $0x2] sm:$0x3]  ;;  %vm565_vm3 = vmmov 1   ;;  %v234_v60 = vlaneseq }
  0x3b   : > { %v155_v2 = vld [vmem:[%s134_s4 + $0x4] sm:$0x3]  ;;  %v156_v3 = vmax.f32 %v153_v0, %v154_v1  ;;  %v158_v4 = vmin.f32 %v153_v0, %v154_v1  ;;  %v566_v16 = vmov 0.0   ;;  %s152_s18 = scalar_lea.vmem [#allocation5], %s374_s29  ;;  %s375_s28 = smul.u32 96, %s552_s9 }
  0x3c   : > { %vm726_vm15 = vcmp.lt.s32.totalorder %v234_v60, 256  ;;  %s271_s25 = sshll.u32 %s152_s18, 4  ;;  %s256_s5 = scalar_lea.sflag [#allocation4], %s692_s27  ;;  %s748_s25 = int_to_ptr.vmem [resolvable:$true] %s271_s25 }
  0x3d   : > { %v702_v5 = vmax.f32 %v156_v3, %v155_v2  ;;  %v159_v6 = vmin.f32 %v158_v4, %v155_v2  ;;  %s758_s2 = scalar_lea.hbm %s811_s1, %s375_s28  ;;  %s478_s12 = scalar_lea.vmem %s748_s25, 96 }
  0x3e   : > { %p479_p8 = scmp.ne.s32.totalorder %s748_s25, %s478_s12  ;;  %p821_p9 = scmp.ne.s32.totalorder %s815_s19, 0 }
  0x3f   : > { %vm160_vm0 = vcmp.eq.f32.partialorder %v702_v5, %v159_v6  ;;  %v161_v7 = vsub.f32 %v702_v5, %v159_v6  ;;  %vm173_vm1 = vcmp.eq.f32.partialorder %v702_v5, %v153_v0  ;;  %vm174_vm2 = vcmp.eq.f32.partialorder %v702_v5, %v154_v1  ;;  %s567_s13 = smov [#allocation5]  }
  0x40   : > { %v167_v9 = vsub.f32 %v702_v5, %v153_v0  ;;  %v169_v10 = vsub.f32 %v702_v5, %v154_v1  ;;  %v171_v11 = vsub.f32 %v702_v5, %v155_v2  ;;  %vm179_vm4 = vmxor %vm173_vm1, %vm565_vm3  ;;  %v364_v17 = vsel %vm173_vm1, 1.0, %v566_v16  ;;  %p480_p11 = pnand %p479_p8, %p821_p9  ;;  %s482_s15 = sshll.u32 %s567_s13, 4  ;;  %s483_s15 = int_to_ptr.vmem [resolvable:$false] %s482_s15 }
  0x41   : > { %v164_v8 = vsel %vm160_vm0, 1.0, %v161_v7  ;;  %vm186_vm5 = vmxor %vm174_vm2, %vm565_vm3  ;;  %v162_v23 = vsel %vm160_vm0, 1.0, %v702_v5  ;;  %s484_s16 = scalar_lea.vmem %s483_s15, 192  ;;  %p485_p5 = scmp.lt.s32.totalorder %s748_s25, %s483_s15 }
  0x42   : > { %444 = vrcp.f32 %v164_v8  ;;  %vm180_vm6 = vmand %vm174_vm2, %vm179_vm4  ;;  %p481_p0 = pneg %p480_p11  ;;  %p486_p13 = scmp.lt.s32.totalorder %s484_s16, %s478_s12 }
  0x43   : > { %vm187_vm7 = vmand %vm186_vm5, %vm179_vm4  ;;  %v365_v21 = vsel %vm180_vm6, 1.0, %v566_v16  ;;  %446 = vrcp.f32 %v162_v23 }
  0x44   : > { %v366_v22 = vsel %vm187_vm7, 1.0, %v566_v16  ;;  %p487_p2 = por %p486_p13, %p485_p5 }
  0x46   : > { %p488_p4 = pnand %p487_p2, %p481_p0 }
  0x4c   : > { %v445_v12 = vpop.eup %444 }
  0x4d   : > { %v168_v13 = vmul.f32 %v445_v12, %v167_v9  ;;  %v170_v14 = vmul.f32 %v445_v12, %v169_v10  ;;  %v172_v15 = vmul.f32 %v445_v12, %v171_v11  ;;  %v447_v34 = vpop.eup %446 }
  0x4e   : > { %v166_v36 = vmul.f32 %v447_v34, %v161_v7 }
  0x4f   : > { %v177_v18 = vsub.f32 %v172_v15, %v170_v14  ;;  %v183_v19 = vadd.f32 2.0, %v168_v13  ;;  %v190_v20 = vadd.f32 4.0, %v170_v14 }
  0x50   : > { %v207_v39 = vsub.f32 1.0, %v166_v36 }
  0x51   : > { %v178_v24 = vmul.f32 %v364_v17, %v177_v18  ;;  %v184_v25 = vsub.f32 %v183_v19, %v172_v15  ;;  %v191_v26 = vsub.f32 %v190_v20, %v168_v13 }
  0x52   : > { %v208_v42 = vmul.f32 %v207_v39, %v702_v5 }
  0x53   : > { %v185_v27 = vmul.f32 %v365_v21, %v184_v25  ;;  %v192_v28 = vmul.f32 %v366_v22, %v191_v26 }
  0x54   : > { %v209_v45 = vmax.f32 %v208_v42, 0.0 }
  0x55   : > { %v193_v29 = vadd.f32 %v185_v27, %v178_v24 }
  0x56   : > { %v210_v49 = vmin.f32 %v209_v45, 1.0 }
  0x57   : > { %v194_v30 = vadd.f32 %v193_v29, %v192_v28 }
  0x59   : > { %v195_v31 = vmul.f32 0.16666667, %v194_v30 }
  0x5b   : > { %v196_v32 = vadd.f32 1.0, %v195_v31 }
  0x5d   : > { %v197_v33 = vfloor.f32 %v196_v32 }
  0x5f   : > { %v198_v35 = vsub.f32 %v196_v32, %v197_v33 }
  0x61   : > { %v199_v37 = vadd.f32 0.1, %v198_v35 }
  0x63   : > { %v200_v38 = vfloor.f32 %v199_v37 }
  0x65   : > { %v201_v40 = vsub.f32 %v199_v37, %v200_v38 }
  0x67   : > { %v202_v41 = vmul.f32 6.0, %v201_v40 }
  0x69   : > { %v203_v43 = vfloor.f32 %v202_v41 }
  0x6b   : > { %v204_v44 = vsub.f32 %v202_v41, %v203_v43  ;;  %vm205_vm8 = vcmp.ge.f32.partialorder %v203_v43, 6.0 }
  0x6c   : > { %v206_v46 = vsel %vm205_vm8, 0.0, %v203_v43 }
  0x6d   : > { %v211_v47 = vmul.f32 %v204_v44, %v166_v36  ;;  %v216_v48 = vsub.f32 1.0, %v204_v44  ;;  %vm222_vm9 = vcmp.eq.f32.partialorder %v206_v46, 0.0  ;;  %vm223_vm10 = vcmp.eq.f32.partialorder %v206_v46, 1.0 }
  0x6e   : > { %v247_v56 = vsel %vm222_vm9, %v210_v49, 0.0  ;;  %v228_v57 = vsel %vm222_vm9, %v702_v5, 0.0  ;;  %vm224_vm11 = vcmp.eq.f32.partialorder %v206_v46, 2.0  ;;  %vm225_vm12 = vcmp.eq.f32.partialorder %v206_v46, 3.0 }
  0x6f   : > { %v212_v50 = vsub.f32 1.0, %v211_v47  ;;  %v217_v51 = vmul.f32 %v216_v48, %v166_v36  ;;  %v248_v61 = vsel %vm223_vm10, %v210_v49, %v247_v56  ;;  %vm226_vm13 = vcmp.eq.f32.partialorder %v206_v46, 4.0 }
  0x70   : > { %vm227_vm14 = vcmp.eq.f32.partialorder %v206_v46, 5.0 }
  0x71   : > { %v213_v52 = vmul.f32 %v212_v50, %v702_v5  ;;  %v218_v53 = vsub.f32 1.0, %v217_v51 }
  0x73   : > { %v214_v54 = vmax.f32 %v213_v52, 0.0  ;;  %v219_v55 = vmul.f32 %v218_v53, %v702_v5 }
  0x75   : > { %v215_v58 = vmin.f32 %v214_v54, 1.0  ;;  %v220_v59 = vmax.f32 %v219_v55, 0.0 }
  0x77   : > { %v221_v62 = vmin.f32 %v220_v59, 1.0  ;;  %v229_v63 = vsel %vm223_vm10, %v215_v58, %v228_v57 }
  0x78   : > { %v230_v0 = vsel %vm224_vm11, %v210_v49, %v229_v63 }
  0x79   : > { %v231_v1 = vsel %vm225_vm12, %v210_v49, %v230_v0  ;;  %v239_v3 = vsel %vm222_vm9, %v221_v62, 0.0  ;;  %v249_v4 = vsel %vm224_vm11, %v221_v62, %v248_v61 }
  0x7a   : > { %v232_v6 = vsel %vm226_vm13, %v221_v62, %v231_v1  ;;  %v240_v7 = vsel %vm223_vm10, %v702_v5, %v239_v3  ;;  %v250_v8 = vsel %vm225_vm12, %v702_v5, %v249_v4 }
  0x7b   : > { %v233_v9 = vsel %vm227_vm14, %v702_v5, %v232_v6  ;;  %v241_v10 = vsel %vm224_vm11, %v702_v5, %v240_v7  ;;  %v251_v11 = vsel %vm226_vm13, %v702_v5, %v250_v8 }
  0x7c   : > { %238 = vst.msk [vmem:[%s152_s18] sm:$0x3] %vm726_vm15, %v233_v9  ;;  %v242_v12 = vsel %vm225_vm12, %v215_v58, %v241_v10  ;;  %v252_v13 = vsel %vm227_vm14, %v215_v58, %v251_v11 }
  0x7d   : > { %v243_v14 = vsel %vm226_vm13, %v210_v49, %v242_v12  ;;  %368 = vst.msk [vmem:[%s152_s18 + $0x4] sm:$0x3] %vm726_vm15, %v252_v13 }
  0x7e   : > { %v244_v5 = vsel %vm227_vm14, %v210_v49, %v243_v14 }
  0x7f   : > { %367 = vst.msk [vmem:[%s152_s18 + $0x2] sm:$0x3] %vm726_vm15, %v244_v5 }
  0x80   : > { %491 = shalt.err (!%p488_p4)
}
  0x81   : > { %s492_s17 = scalar_lea.hbm %s758_s2, 96  ;;  %s496_s24 = scalar_lea.hbm %s811_s1, 192 }
  0x82   : > { %p493_p6 = scmp.ne.s32.totalorder %s758_s2, %s492_s17  ;;  %p497_p12 = scmp.lt.u32.totalorder %s758_s2, %s811_s1 }
  0x83   : > { %p498_p1 = scmp.lt.u32.totalorder %s496_s24, %s492_s17  ;;  %p500_p8 = scmp.lt.u32.totalorder %s492_s17, %s758_s2 }
  0x84   : > { %p494_p7 = pnand %p493_p6, %p821_p9 }
  0x85   : > { %p499_p3 = por %p498_p1, %p497_p12 }
  0x86   : > { %p495_p10 = pneg %p494_p7 }
  0x87   : > { %p501_p11 = por %p500_p8, %p499_p3 }
  0x89   : > { %p502_p0 = pnand %p501_p11, %p495_p10 }
  0x8b   : > { %505 = shalt.err (!%p502_p0)
}
  0x8c   : > { %s568_s3 = smov 32   ;;  %s569_s4 = smov 2  }
  0x8d   : > { %378 = dma.vmem_to_hbm [thread:$0]  (%p821_p9), %s748_s25, 96, %s758_s2, %s256_s5, %s568_s3, %s568_s3, %s569_s4  }
  0x8e PF: > { %s286_s18 = sand.u32 1, %s540_s6   ;;  %p822_p5 = scmp.ne.s32.totalorder %s816_s21, 0 }
  0x8f   : > { %p823_p13 = scmp.ge.s32.totalorder %s560_s11, 2  ;;  %s287_s28 = scalar_lea.sflag [#allocation4], %s286_s18 }
  0x91   : > { %p385_p2 = pnand %p823_p13, %p822_p5 }
  0x93   : > { %535 = dma.done.wait (!%p385_p2), %s287_s28, 96  }
  0x94   : > { %537 = vsyncadd (!%p385_p2), %s287_s28, 4294967200  ;;  %s17_s11 = sadd.s32 1, %s560_s11   ;;  %s824_s6 = smov %s544_s7 }
  0x95   : > { %p14_p4 = scmp.ge.s32.totalorder %s17_s11, 4   ;;  %s825_s7 = smov %s548_s8 }
  0x96   : > { %s826_s8 = smov %s636_s20  ;;  %s827_s9 = smov %s556_s10 }
  0x97   : > { %s828_s10 = smov %s830_s14  ;;  %16 = sbr.rel (!%p14_p4) target bundleno = 6 (0x6), region = 71 }
  0x9e   :  { %292 = vsyncpa [#allocation3], 1 }
  0x9f   :  { %294 = vsyncpa [#allocation3 + $0x1], 1 }
  0xa0   :  { %295 = vsyncpa [#allocation4], 1 }
  0xa1   :  { %297 = vsyncpa [#allocation4 + $0x1], 1 }

</bundles_post_ra>
